<compile_context>
chip_gen: v7x
topology: tpu7x:2x2x1
jax: 0.10.0
libtpu: 0.0.40
codegen_flags: <defaults>
</compile_context>

<pallas_src>
import functools

import jax
import jax.numpy as jnp
from jax.experimental import pallas as pl
from jax.experimental.pallas import tpu as pltpu


# ----------------------------------------------------------------------------
# Parameter slab layout
# ----------------------------------------------------------------------------
def _round_up(n, m):
    return ((n + m - 1) // m) * m


def make_layout(input_dim, hidden_dim, latent_dim):
    """Row layout of the packed parameter slab.

    Each layer occupies a block of rows: W (n_in rows) followed by b (1 row),
    padded to a multiple of 8 rows so all static slices are sublane-aligned.
    Returns (layout dict: name -> (row_start, n_in, n_out), total_rows, n_cols).
    """
    h2 = hidden_dim // 2
    order = [
        ("enc1", input_dim, hidden_dim),
        ("enc2", hidden_dim, h2),
        ("heads", h2, 2 * latent_dim),   # fused mu|logvar head
        ("dec1", latent_dim, h2),
        ("dec2", h2, hidden_dim),
        ("dec3", hidden_dim, input_dim),
    ]
    layout = {}
    row = 0
    n_cols = 0
    for name, n_in, n_out in order:
        layout[name] = (row, n_in, n_out)
        row += _round_up(n_in + 1, 8)
        n_cols = max(n_cols, n_out)
    return layout, row, n_cols


def pack_params(params, layout, total_rows, n_cols):
    """Pack the 14 per-layer arrays into one (total_rows, n_cols) f32 slab."""
    (w1, b1, w2, b2, wmu, bmu, wvar, bvar,
     wd1, bd1, wd2, bd2, wd3, bd3) = params
    # Fuse mu / logvar heads along the output (lane) axis.
    wmv = jnp.concatenate([wmu, wvar], axis=1)
    bmv = jnp.concatenate([bmu, bvar], axis=1)
    blocks = {
        "enc1": (w1, b1), "enc2": (w2, b2), "heads": (wmv, bmv),
        "dec1": (wd1, bd1), "dec2": (wd2, bd2), "dec3": (wd3, bd3),
    }
    slab = jnp.zeros((total_rows, n_cols), dtype=jnp.float32)
    for name, (w, b) in blocks.items():
        r0, n_in, n_out = layout[name]
        slab = slab.at[r0:r0 + n_in, :n_out].set(w)
        slab = slab.at[r0 + n_in, :n_out].set(b[0])
    return slab


# ----------------------------------------------------------------------------
# Kernel
# ----------------------------------------------------------------------------
def vae_forward_kernel(x_ref, eps_ref, p_ref, out_ref, *, layout, input_dim, latent_dim):
    x = x_ref[...]      # (B, input_dim)
    eps = eps_ref[...]  # (B, latent_dim)

    def layer(act, name):
        r0, n_in, n_out = layout[name]
        w = p_ref[r0:r0 + n_in, :n_out]               # static slice: (n_in, n_out)
        b = p_ref[r0 + n_in:r0 + n_in + 1, :n_out]    # static slice: (1, n_out)
        return jnp.dot(act, w, preferred_element_type=jnp.float32) + b

    # ---------------- encoder ----------------
    h = jnp.maximum(layer(x, "enc1"), 0.0)   # Linear + ReLU  (Dropout -> identity)
    h = jnp.maximum(layer(h, "enc2"), 0.0)   # Linear + ReLU  (Dropout -> identity)

    # Fused mu|logvar head: single matmul, split the lane columns.
    mv = layer(h, "heads")                   # (B, 2*latent_dim)
    mu = mv[:, :latent_dim]
    logvar = mv[:, latent_dim:]

    # ---------------- reparameterize ----------------
    z = mu + eps * jnp.exp(0.5 * logvar)

    # ---------------- decoder ----------------
    d = jnp.maximum(layer(z, "dec1"), 0.0)   # Linear + ReLU  (Dropout -> identity)
    d = jnp.maximum(layer(d, "dec2"), 0.0)   # Linear + ReLU  (Dropout -> identity)
    recon = jax.nn.sigmoid(layer(d, "dec3"))

    # Single lane-dense output: [recon | mu | logvar]  (one store instead of three).
    out_ref[...] = jnp.concatenate([recon, mv], axis=1)


# ----------------------------------------------------------------------------
# Wrapper
# ----------------------------------------------------------------------------
def vae_forward(x, eps, slab, *, input_dim, latent_dim, layout):
    B = x.shape[0]
    out_cols = input_dim + 2 * latent_dim
    vmem = pl.BlockSpec(memory_space=pltpu.MemorySpace.VMEM)
    kernel = functools.partial(
        vae_forward_kernel, layout=layout, input_dim=input_dim, latent_dim=latent_dim)
    out = pl.pallas_call(
        kernel,
        out_shape=jax.ShapeDtypeStruct((B, out_cols), jnp.float32),
        in_specs=[vmem, vmem, vmem],
        out_specs=vmem,
    )(x, eps, slab)
    recon = out[:, :input_dim]
    mu = out[:, input_dim:input_dim + latent_dim]
    logvar = out[:, input_dim + latent_dim:]
    return recon, mu, logvar


def init_params(key, input_dim, hidden_dim, latent_dim):
    """Deterministic synthetic parameter init. Weights stored (in, out)."""
    h2 = hidden_dim // 2
    dims = [
        ("w1", (input_dim, hidden_dim)), ("b1", (1, hidden_dim)),
        ("w2", (hidden_dim, h2)),        ("b2", (1, h2)),
        ("wmu", (h2, latent_dim)),       ("bmu", (1, latent_dim)),
        ("wvar", (h2, latent_dim)),      ("bvar", (1, latent_dim)),
        ("wd1", (latent_dim, h2)),       ("bd1", (1, h2)),
        ("wd2", (h2, hidden_dim)),       ("bd2", (1, hidden_dim)),
        ("wd3", (hidden_dim, input_dim)),("bd3", (1, input_dim)),
    ]
    params = []
    keys = jax.random.split(key, len(dims))
    for k, (_, shape) in zip(keys, dims):
        params.append(0.1 * jax.random.normal(k, shape, dtype=jnp.float32))
    return params


if __name__ == "__main__":
    B, input_dim, hidden_dim, latent_dim = 8, 16, 32, 8

    key = jax.random.PRNGKey(0)
    k_x, k_eps, k_params = jax.random.split(key, 3)

    x = jax.random.uniform(k_x, (B, input_dim), dtype=jnp.float32)
    # eps ~ N(0, 1) for the reparameterization trick (torch.randn_like equivalent).
    eps = jax.random.normal(k_eps, (B, latent_dim), dtype=jnp.float32)
    params = init_params(k_params, input_dim, hidden_dim, latent_dim)

    layout, total_rows, n_cols = make_layout(input_dim, hidden_dim, latent_dim)
    slab = pack_params(params, layout, total_rows, n_cols)

    recon, mu, logvar = vae_forward(
        x, eps, slab, input_dim=input_dim, latent_dim=latent_dim, layout=layout)
    jax.block_until_ready((recon, mu, logvar))

    # Pure-JAX reference check (uses the original, unpacked parameters).
    (w1, b1, w2, b2, wmu, bmu, wvar, bvar, wd1, bd1, wd2, bd2, wd3, bd3) = params
    h = jnp.maximum(x @ w1 + b1, 0.0)
    h = jnp.maximum(h @ w2 + b2, 0.0)
    mu_r = h @ wmu + bmu
    lv_r = h @ wvar + bvar
    z = mu_r + eps * jnp.exp(0.5 * lv_r)
    d = jnp.maximum(z @ wd1 + bd1, 0.0)
    d = jnp.maximum(d @ wd2 + bd2, 0.0)
    recon_r = jax.nn.sigmoid(d @ wd3 + bd3)

    assert jnp.allclose(recon, recon_r, atol=1e-5), "recon mismatch"
    assert jnp.allclose(mu, mu_r, atol=1e-5), "mu mismatch"
    assert jnp.allclose(logvar, lv_r, atol=1e-5), "logvar mismatch"

    print("KERNEL_OK")
</pallas_src>

<mosaic_0001>
module attributes {stable_mosaic.version = 11 : i64} {
  func.func @vae_forward_kernel(%arg0: memref<8x16xf32, #tpu.memory_space<vmem>>, %arg1: memref<8x8xf32, #tpu.memory_space<vmem>>, %arg2: memref<168x32xf32, #tpu.memory_space<vmem>>, %arg3: memref<8x32xf32, #tpu.memory_space<vmem>>) attributes {dimension_semantics = [], scalar_prefetch = 0 : i64, scratch_operands = 0 : i64, tpu.core_type = #tpu.core_type<tc>} {
    %c0 = arith.constant 0 : index
    %c0_0 = arith.constant 0 : index
    %0 = vector.load %arg0[%c0, %c0_0] : memref<8x16xf32, #tpu.memory_space<vmem>>, vector<8x16xf32>
    %c0_1 = arith.constant 0 : index
    %c0_2 = arith.constant 0 : index
    %1 = vector.load %arg1[%c0_1, %c0_2] : memref<8x8xf32, #tpu.memory_space<vmem>>, vector<8x8xf32>
    %c0_3 = arith.constant 0 : index
    %c0_4 = arith.constant 0 : index
    %2 = vector.load %arg2[%c0_3, %c0_4] : memref<168x32xf32, #tpu.memory_space<vmem>>, vector<16x32xf32>
    %c16 = arith.constant 16 : index
    %c0_5 = arith.constant 0 : index
    %3 = vector.load %arg2[%c16, %c0_5] : memref<168x32xf32, #tpu.memory_space<vmem>>, vector<1x32xf32>
    %cst = arith.constant dense<0.000000e+00> : vector<8x32xf32>
    %4 = tpu.matmul %0, %2, %cst {dimension_numbers = #tpu.dot_dimension_numbers<[1], [0], [0], [1], [0, 0, 1, 1], [], []>} : vector<8x16xf32>, vector<16x32xf32>, vector<8x32xf32> -> vector<8x32xf32>
    %5 = vector.broadcast %3 : vector<1x32xf32> to vector<8x32xf32>
    %6 = arith.addf %4, %5 : vector<8x32xf32>
    %cst_6 = arith.constant 0.000000e+00 : f32
    %7 = vector.broadcast %cst_6 : f32 to vector<8x32xf32>
    %8 = arith.maximumf %6, %7 : vector<8x32xf32>
    %c24 = arith.constant 24 : index
    %c0_7 = arith.constant 0 : index
    %9 = vector.load %arg2[%c24, %c0_7] : memref<168x32xf32, #tpu.memory_space<vmem>>, vector<32x16xf32>
    %c56 = arith.constant 56 : index
    %c0_8 = arith.constant 0 : index
    %10 = vector.load %arg2[%c56, %c0_8] : memref<168x32xf32, #tpu.memory_space<vmem>>, vector<1x16xf32>
    %cst_9 = arith.constant dense<0.000000e+00> : vector<8x16xf32>
    %11 = tpu.matmul %8, %9, %cst_9 {dimension_numbers = #tpu.dot_dimension_numbers<[1], [0], [0], [1], [0, 0, 1, 1], [], []>} : vector<8x32xf32>, vector<32x16xf32>, vector<8x16xf32> -> vector<8x16xf32>
    %12 = vector.broadcast %10 : vector<1x16xf32> to vector<8x16xf32>
    %13 = arith.addf %11, %12 : vector<8x16xf32>
    %cst_10 = arith.constant 0.000000e+00 : f32
    %14 = vector.broadcast %cst_10 : f32 to vector<8x16xf32>
    %15 = arith.maximumf %13, %14 : vector<8x16xf32>
    %c64 = arith.constant 64 : index
    %c0_11 = arith.constant 0 : index
    %16 = vector.load %arg2[%c64, %c0_11] : memref<168x32xf32, #tpu.memory_space<vmem>>, vector<16x16xf32>
    %c80 = arith.constant 80 : index
    %c0_12 = arith.constant 0 : index
    %17 = vector.load %arg2[%c80, %c0_12] : memref<168x32xf32, #tpu.memory_space<vmem>>, vector<1x16xf32>
    %cst_13 = arith.constant dense<0.000000e+00> : vector<8x16xf32>
    %18 = tpu.matmul %15, %16, %cst_13 {dimension_numbers = #tpu.dot_dimension_numbers<[1], [0], [0], [1], [0, 0, 1, 1], [], []>} : vector<8x16xf32>, vector<16x16xf32>, vector<8x16xf32> -> vector<8x16xf32>
    %19 = vector.broadcast %17 : vector<1x16xf32> to vector<8x16xf32>
    %20 = arith.addf %18, %19 : vector<8x16xf32>
    %21 = vector.extract_strided_slice %20 {offsets = [0, 0], sizes = [8, 8], strides = [1, 1]} : vector<8x16xf32> to vector<8x8xf32>
    %22 = vector.extract_strided_slice %20 {offsets = [0, 8], sizes = [8, 8], strides = [1, 1]} : vector<8x16xf32> to vector<8x8xf32>
    %cst_14 = arith.constant 5.000000e-01 : f32
    %23 = vector.broadcast %cst_14 : f32 to vector<8x8xf32>
    %24 = arith.mulf %23, %22 : vector<8x8xf32>
    %25 = math.exp %24 : vector<8x8xf32>
    %26 = arith.mulf %1, %25 : vector<8x8xf32>
    %27 = arith.addf %21, %26 : vector<8x8xf32>
    %c88 = arith.constant 88 : index
    %c0_15 = arith.constant 0 : index
    %28 = vector.load %arg2[%c88, %c0_15] : memref<168x32xf32, #tpu.memory_space<vmem>>, vector<8x16xf32>
    %c96 = arith.constant 96 : index
    %c0_16 = arith.constant 0 : index
    %29 = vector.load %arg2[%c96, %c0_16] : memref<168x32xf32, #tpu.memory_space<vmem>>, vector<1x16xf32>
    %cst_17 = arith.constant dense<0.000000e+00> : vector<8x16xf32>
    %30 = tpu.matmul %27, %28, %cst_17 {dimension_numbers = #tpu.dot_dimension_numbers<[1], [0], [0], [1], [0, 0, 1, 1], [], []>} : vector<8x8xf32>, vector<8x16xf32>, vector<8x16xf32> -> vector<8x16xf32>
    %31 = vector.broadcast %29 : vector<1x16xf32> to vector<8x16xf32>
    %32 = arith.addf %30, %31 : vector<8x16xf32>
    %cst_18 = arith.constant 0.000000e+00 : f32
    %33 = vector.broadcast %cst_18 : f32 to vector<8x16xf32>
    %34 = arith.maximumf %32, %33 : vector<8x16xf32>
    %c104 = arith.constant 104 : index
    %c0_19 = arith.constant 0 : index
    %35 = vector.load %arg2[%c104, %c0_19] : memref<168x32xf32, #tpu.memory_space<vmem>>, vector<16x32xf32>
    %c120 = arith.constant 120 : index
    %c0_20 = arith.constant 0 : index
    %36 = vector.load %arg2[%c120, %c0_20] : memref<168x32xf32, #tpu.memory_space<vmem>>, vector<1x32xf32>
    %cst_21 = arith.constant dense<0.000000e+00> : vector<8x32xf32>
    %37 = tpu.matmul %34, %35, %cst_21 {dimension_numbers = #tpu.dot_dimension_numbers<[1], [0], [0], [1], [0, 0, 1, 1], [], []>} : vector<8x16xf32>, vector<16x32xf32>, vector<8x32xf32> -> vector<8x32xf32>
    %38 = vector.broadcast %36 : vector<1x32xf32> to vector<8x32xf32>
    %39 = arith.addf %37, %38 : vector<8x32xf32>
    %cst_22 = arith.constant 0.000000e+00 : f32
    %40 = vector.broadcast %cst_22 : f32 to vector<8x32xf32>
    %41 = arith.maximumf %39, %40 : vector<8x32xf32>
    %c128 = arith.constant 128 : index
    %c0_23 = arith.constant 0 : index
    %42 = vector.load %arg2[%c128, %c0_23] : memref<168x32xf32, #tpu.memory_space<vmem>>, vector<32x16xf32>
    %c160 = arith.constant 160 : index
    %c0_24 = arith.constant 0 : index
    %43 = vector.load %arg2[%c160, %c0_24] : memref<168x32xf32, #tpu.memory_space<vmem>>, vector<1x16xf32>
    %cst_25 = arith.constant dense<0.000000e+00> : vector<8x16xf32>
    %44 = tpu.matmul %41, %42, %cst_25 {dimension_numbers = #tpu.dot_dimension_numbers<[1], [0], [0], [1], [0, 0, 1, 1], [], []>} : vector<8x32xf32>, vector<32x16xf32>, vector<8x16xf32> -> vector<8x16xf32>
    %45 = vector.broadcast %43 : vector<1x16xf32> to vector<8x16xf32>
    %46 = arith.addf %44, %45 : vector<8x16xf32>
    %47 = arith.negf %46 : vector<8x16xf32>
    %48 = math.exp %47 : vector<8x16xf32>
    %cst_26 = arith.constant 1.000000e+00 : f32
    %49 = vector.broadcast %cst_26 : f32 to vector<8x16xf32>
    %50 = arith.addf %49, %48 : vector<8x16xf32>
    %51 = arith.divf %49, %50 : vector<8x16xf32>
    %52 = tpu.concatenate %51, %20 in 1 : vector<8x16xf32>, vector<8x16xf32> -> vector<8x32xf32>
    %c0_27 = arith.constant 0 : index
    %c0_28 = arith.constant 0 : index
    %53 = vector.load %arg3[%c0_27, %c0_28] : memref<8x32xf32, #tpu.memory_space<vmem>>, vector<8x32xf32>
    tpu.vector_store %arg3[%c0_27, %c0_28], %52 {strides = array<i32>} : memref<8x32xf32, #tpu.memory_space<vmem>>, vector<8x32xf32>,
    return
  }
}

</mosaic_0001>

<bundles_post_ra>
// kernel: tpu_custom_call.1
= control target key start
LH: loop header
LB: loop body
LE: loop exit
PB: predicated region body
PF: predicated region fallthrough
CT: control target
= control target key end

     0   :  { %v681_v2 = vmov 0.0|0.0   ;;  %vm682_vm0 = vmmov 0   ;;  %v683_v4 = vmov 0.0   ;;  %s808_s0 = inlined_call_operand.vmem [shape: f32[8,16], index: 0, kind: input, shape index: {}]   ;;  %s809_s1 = inlined_call_operand.vmem [shape: f32[8,8], index: 1, kind: input, shape index: {}]   ;;  %s810_s2 = inlined_call_operand.vmem [shape: f32[168,32], index: 2, kind: input, shape index: {}]   ;;  %s811_s3 = inlined_call_operand.hbm [shape: f32[8,32], index: 3, kind: output, shape index: {}]  }
   0x1   :  { %v17_v0 = vld [vmem:[%s810_s2] sm:$0xff]  ;;  %v18_v1 = vld [vmem:[%s810_s2 + $0x8] sm:$0xff]  ;;  %624 = vmatprep.subr.bf16.mxu1 %v681_v2  ;;  %580 = vmatprep.mubr.msk.f32.mxu1 %vm682_vm0, %v683_v4  ;;  %v99_v5 = vld [vmem:[%s810_s2 + $0x18] sm:$0xff] }
   0x2   :  { %v625_v3 = vpack.c.bf16 %v18_v1, %v17_v0  ;;  %v100_v6 = vld [vmem:[%s810_s2 + $0x20] sm:$0xff]  ;;  %633 = vmatprep.subr.bf16.mxu0 %v681_v2  ;;  %598 = vmatprep.mubr.msk.f32.mxu0 %vm682_vm0, %v683_v4 }
   0x3   :  { %8 = vsyncpa [#allocation3], 0  ;;  %v15_v7 = vld [vmem:[%s808_s0] sm:$0xff]  ;;  %vm24_vm1 = vcmask 130048   ;;  %v628_v8 = vpack.c.bf16 %v100_v6, %v99_v5  ;;  %v101_v9 = vld [vmem:[%s810_s2 + $0x28] sm:$0xff]  ;;  %vm108_vm2 = vcmask 261120  }
   0x4   :  { %626 = vmatpush3.bf16.msra.mxu1 %v625_v3  ;;  %v102_v10 = vld [vmem:[%s810_s2 + $0x30] sm:$0xff]  ;;  %v183_v17 = vld [vmem:[%s810_s2 + $0x40] sm:$0xff]  ;;  %v184_v18 = vld [vmem:[%s810_s2 + $0x48] sm:$0xff]  ;;  %s684_s10 = smov 120   ;;  %s685_s11 = smov 16   ;;  %vm278_vm3 = vcmask 64512  }
   0x5   :  { %627 = vmatprep.subr.bf16.mxu1 %v681_v2  ;;  %v631_v11 = vpack.c.bf16 %v102_v10, %v101_v9  ;;  %v542_v12 = vld [vmem:[%s810_s2 + $0x10] ss:$0 sm:$0xff]  ;;  %v634_v19 = vpack.c.bf16 %v184_v18, %v183_v17  ;;  %v544_v20 = vld [vmem:[%s810_s2 + $0x38] ss:$0 sm:$0xff]  ;;  %v16_v33 = vld [vmem:[%s809_s1] sm:$0xff]  ;;  %s686_s30 = smov [#allocation2]  }
   0x6   :  { %v546_v25 = vld [vmem:[%s810_s2 + $0x50] ss:$0 sm:$0xff]  ;;  %v272_v31 = vld [vmem:[%s810_s2 + $0x58] sm:$0xff]  ;;  %v353_v37 = vld [vmem:[%s810_s2 + $0x68] sm:$0xff]  ;;  %s534_s4 = sshll.u32 %s686_s30, 4  ;;  %s535_s4 = int_to_ptr.vmem [resolvable:$true] %s534_s4 }
   0x7   :  { %581 = vmatmul.mubr.msk.f32.vlgmr.msra.gmra.mrb[0].mxu1 %vm24_vm1, %v15_v7  ;;  %635 = vmatpush3.bf16.msra.mxu0 %v634_v19  ;;  %v354_v38 = vld [vmem:[%s810_s2 + $0x70] sm:$0xff]  ;;  %v434_v40 = vld [vmem:[%s810_s2 + $0x80] sm:$0xff]  ;;  %v435_v41 = vld [vmem:[%s810_s2 + $0x88] sm:$0xff]  ;;  %s657_s5 = scalar_lea.vmem %s535_s4, 128  ;;  %p662_p1 = scmp.lt.s32.totalorder %s535_s4, %s535_s4 }
   0x8   :  { %629 = vmatpush3.bf16.msra.mxu1 %v628_v8  ;;  %591 = vmatprep.mubr.msk.f32.mxu1 %vm682_vm0, %v683_v4  ;;  %v637_v39 = vpack.c.bf16 %v354_v38, %v353_v37  ;;  %v640_v42 = vpack.c.bf16 %v435_v41, %v434_v40  ;;  %v548_v43 = vld [vmem:[%s810_s2 + $0x60] ss:$0 sm:$0xff]  ;;  %v436_v48 = vld [vmem:[%s810_s2 + $0x90] sm:$0xff]  ;;  %v437_v49 = vld [vmem:[%s810_s2 + $0x98] sm:$0xff]  ;;  %p658_p0 = scmp.ne.s32.totalorder %s535_s4, %s657_s5  ;;  %p663_p2 = scmp.lt.s32.totalorder %s657_s5, %s657_s5 }
   0x9   :  { %630 = vmatprep.subr.bf16.mxu1 %v681_v2  ;;  %601 = vmatprep.subr.mxu0 %v683_v4  ;;  %v643_v50 = vpack.c.bf16 %v437_v49, %v436_v48  ;;  %v550_v51 = vld [vmem:[%s810_s2 + $0x78] ss:$0 sm:$0xff]  ;;  %v552_v56 = vld [vmem:[%s810_s2 + $0xa0] ss:$0 sm:$0xff] }
   0xa   :  { %p664_p3 = por %p663_p2, %p662_p1 }
   0xc   :  { %632 = vmatpush3.bf16.msra.mxu1 %v631_v11  ;;  %p665_p4 = pnand %p664_p3, %p658_p0 }
   0xd   :  { %636 = vmatprep.subr.bf16.mxu1 %v681_v2 }
  0xda   :  { %v94_v13 = vpop.f32.mrb[0].mxu1 }
  0xdb   :  { %v95_v14 = vadd.f32 %v542_v12, %v94_v13  ;;  %v582_v15 = vpop.f32.mrb[1].mxu1 }
  0xdd   :  { %v98_v16 = vmax.f32 %v95_v14, 0.0 }
  0xdf   :  { %592 = vmatmul.mubr.msk.f32.vlgmr.msra.gmra.mrb[2].mxu1 %vm108_vm2, %v98_v16 }
  0xe0   :  { %610 = vmatprep.mubr.msk.f32.mxu1 %vm682_vm0, %v683_v4  ;;  %638 = vmatpush3.bf16.msra.mxu1 %v637_v39 }
 0x1b2   :  { %v178_v21 = vpop.f32.mrb[2].mxu1 }
 0x1b3   :  { %v179_v22 = vadd.f32 %v544_v20, %v178_v21  ;;  %v593_v23 = vpop.f32.mrb[3].mxu1 }
 0x1b5   :  { %v182_v24 = vmax.f32 %v179_v22, 0.0 }
 0x1b7   :  { %599 = vmatmul.mubr.msk.f32.vlgmr.msra.gmra.mrb[0].mxu0 %vm24_vm1, %v182_v24 }
 0x1b8   :  { %603 = vmatprep.mubr.msk.f32.mxu0 %vm682_vm0, %v683_v4  ;;  %602 = vmatpush3.msra.mxu0 %v272_v31 }
 0x1b9   :  { %639 = vmatprep.subr.bf16.mxu0 %v681_v2 }
 0x28a   :  { %v259_v26 = vpop.f32.mrb[0].mxu0 }
 0x28b   :  { %v260_v27 = vadd.f32 %v546_v25, %v259_v26  ;;  %v600_v28 = vpop.f32.mrb[1].mxu0 }
 0x28d   :  { %v263_v29 = vmul.f32 0.5, %v260_v27 }
 0x28f   :  { %v264_v30 = vmul.f32 1.442695, %v263_v29 }
 0x291   :  { %651 = vpow2.f32 %v264_v30 }
 0x29b   :  { %v652_v32 = vpop.eup %651 }
 0x29c   :  { %267 = vrot.lane.b32.xlu0 %v652_v32, %s684_s10 }
 0x2a0   :  { %523 = vrot.lane.b32.xlu0 %v260_v27, %s685_s11 }
 0x30e   :  { %v268_v34 = vpop.permute.xlu0 %267 }
 0x30f   :  { %v270_v35 = vmul.f32 %v268_v34, %v16_v33 }
 0x311   :  { %v271_v36 = vadd.f32 %v270_v35, %v260_v27 }
 0x312   :  { %v524_v0 = vpop.permute.xlu0 %523 }
 0x313   :  { %604 = vmatmul.mubr.msk.f32.vlgmr.msra.gmra.mrb[2].mxu0 %vm278_vm3, %v271_v36 }
 0x314   :  { %621 = vmatprep.mubr.msk.f32.mxu0 %vm682_vm0, %v683_v4  ;;  %641 = vmatpush3.bf16.msra.mxu0 %v640_v42 }
 0x315   :  { %642 = vmatprep.subr.bf16.mxu0 %v681_v2 }
 0x318   :  { %644 = vmatpush3.bf16.msra.mxu0 %v643_v50 }
 0x3e6   :  { %v348_v44 = vpop.f32.mrb[2].mxu0 }
 0x3e7   :  { %v349_v45 = vadd.f32 %v548_v43, %v348_v44  ;;  %v605_v46 = vpop.f32.mrb[3].mxu0 }
 0x3e9   :  { %v352_v47 = vmax.f32 %v349_v45, 0.0 }
 0x3eb   :  { %611 = vmatmul.mubr.msk.f32.vlgmr.msra.gmra.mrb[4].mxu1 %vm24_vm1, %v352_v47 }
 0x4be   :  { %v429_v52 = vpop.f32.mrb[4].mxu1 }
 0x4bf   :  { %v430_v53 = vadd.f32 %v550_v51, %v429_v52  ;;  %v612_v54 = vpop.f32.mrb[5].mxu1 }
 0x4c1   :  { %v433_v55 = vmax.f32 %v430_v53, 0.0 }
 0x4c3   :  { %622 = vmatmul.mubr.msk.f32.vlgmr.msra.gmra.mrb[4].mxu0 %vm108_vm2, %v433_v55 }
 0x596   :  { %v512_v57 = vpop.f32.mrb[4].mxu0 }
 0x597   :  { %v513_v58 = vadd.f32 %v552_v56, %v512_v57  ;;  %v623_v59 = vpop.f32.mrb[5].mxu0 }
 0x599   :  { %v554_v60 = vmul.f32 -1.442695, %v513_v58 }
 0x59b   :  { %653 = vpow2.f32 %v554_v60 }
 0x5a5   :  { %v654_v61 = vpop.eup %653 }
 0x5a6   :  { %v519_v62 = vadd.f32 1.0, %v654_v61 }
 0x5a8   :  { %655 = vrcp.f32 %v519_v62 }
 0x5b2   :  { %v656_v63 = vpop.eup %655 }
 0x5b3   :  { %v526_v1 = vsel %vm24_vm1, %v656_v63, %v524_v0 }
 0x5b4   :  { %527 = vst.msk [vmem:[#allocation2] sm:$0xff] %vm108_vm2, %v526_v1 }
 0x5b5   :  { %668 = shalt.err (!%p665_p4)
}
 0x5b6   :  { %s669_s7 = scalar_lea.hbm %s811_s3, 128 }
 0x5b7   :  { %p670_p5 = scmp.ne.s32.totalorder %s811_s3, %s669_s7  ;;  %p673_p6 = scmp.lt.u32.totalorder %s669_s7, %s811_s3 }
 0x5b9   :  { %p675_p7 = pnand %p673_p6, %p670_p5 }
 0x5bb   :  { %678 = shalt.err (!%p675_p7)
}
 0x5bc   :  { %537 = dma.vmem_to_hbm [thread:$0]  %s535_s4, 128, %s811_s3, [#allocation3]  }
 0x5bd   :  { %679 = dma.done.wait [#allocation3], 128  }
 0x5be   :  { %680 = vsyncadd [#allocation3], 4294967168 }
 0x5bf   :  { %541 = vsyncpa [#allocation3], 1 }

</bundles_post_ra>
